<compile_context>
chip_gen: v7x
topology: tpu7x:2x2x1
jax: 0.10.0
libtpu: 0.0.40
codegen_flags: <defaults>
</compile_context>

<pallas_src>
import functools

import jax
import jax.numpy as jnp
from jax.experimental import pallas as pl
from jax.experimental.pallas import tpu as pltpu


def _combined_ordinal_ce_kernel(num_tasks, num_classes, batch, block_b,
                                logits_ref, targets_ref, thr_ref, w_ref,
                                total_ref, dim_losses_ref,
                                acc_loss_ref, acc_cnt_ref):
    T, C = num_tasks, num_classes
    Cm1 = C - 1
    i = pl.program_id(0)

    @pl.when(i == 0)
    def _init():
        acc_loss_ref[...] = jnp.zeros_like(acc_loss_ref)
        acc_cnt_ref[...] = jnp.zeros_like(acc_cnt_ref)

    # Global-row in-bounds mask for the (possibly partial) last batch tile.
    lane = jax.lax.broadcasted_iota(jnp.int32, (1, block_b), 1)
    in_bounds = (i * block_b + lane) < batch                          # (1, block_b)

    # Load the full tiles once and upcast to f32 (vectorized conversion).
    lg = logits_ref[...].astype(jnp.float32)                          # (T*Cm1, block_b)
    tgt = targets_ref[...].astype(jnp.float32)                        # (T*C,  block_b)

    for t in range(T):                                                # T is small & static
        rows = [tgt[t * C + c: t * C + c + 1, :] for c in range(C)]   # each (1, block_b)

        # ---- validity + argmax over the C class rows (unrolled compare chain) ----
        any_nan = jnp.isnan(rows[0])
        best_val = rows[0]
        best_idx = jnp.zeros((1, block_b), jnp.int32)
        for c in range(1, C):
            v = rows[c]
            any_nan = jnp.logical_or(any_nan, jnp.isnan(v))
            take = v > best_val            # strict ">" keeps the first max (torch argmax)
            best_val = jnp.where(take, v, best_val)
            best_idx = jnp.where(take, c, best_idx)
        valid = jnp.logical_and(in_bounds, jnp.logical_not(any_nan))  # (1, block_b)

        # ---- ordinal BCE-with-logits summed over the C-1 thresholds ----
        bce_sum = jnp.zeros((1, block_b), jnp.float32)
        for k in range(Cm1):
            z = lg[t * Cm1 + k: t * Cm1 + k + 1, :] - thr_ref[t, k]   # scalar thr from SMEM
            y = (best_idx > k).astype(jnp.float32)
            bce_sum = bce_sum + (jnp.maximum(z, 0.0) - z * y
                                 + jnp.log1p(jnp.exp(-jnp.abs(z))))

        # where (not multiply) so NaN/garbage from invalid or padded rows never leaks.
        acc_loss_ref[pl.ds(t, 1), :] += jnp.where(valid, bce_sum, 0.0)
        acc_cnt_ref[pl.ds(t, 1), :] += valid.astype(jnp.float32)

    @pl.when(i == pl.num_programs(0) - 1)
    def _finalize():
        lane_t = jax.lax.broadcasted_iota(jnp.int32, (1, T), 1)
        dim_vec = jnp.zeros((1, T), jnp.float32)
        weighted_sum = jnp.zeros((1, 1), jnp.float32)
        wsum = jnp.zeros((1, 1), jnp.float32)
        for t in range(T):
            loss_sum = jnp.sum(acc_loss_ref[pl.ds(t, 1), :], axis=1, keepdims=True)  # (1,1)
            count = jnp.sum(acc_cnt_ref[pl.ds(t, 1), :], axis=1, keepdims=True)      # (1,1)
            denom = jnp.maximum(count * jnp.float32(Cm1), 1.0)
            has_valid = count > 0.0
            task_loss = jnp.where(has_valid, loss_sum / denom, 0.0)
            w_eff = jnp.where(has_valid, w_ref[t], 0.0)               # mask-gated weight
            weighted = w_eff * task_loss                              # (1, 1)
            dim_vec = jnp.where(lane_t == t, weighted, dim_vec)
            weighted_sum = weighted_sum + weighted
            wsum = wsum + w_eff
        dim_losses_ref[...] = dim_vec
        total_ref[...] = weighted_sum / jnp.maximum(wsum, jnp.float32(1e-8))


def combined_ordinal_ce_loss(logits, targets, raw_thresholds, weights,
                             num_classes, num_tasks, max_block_b=32768):
    """Returns (total_loss scalar, dim_losses [num_tasks]) like the PyTorch module."""
    B = logits.shape[0]
    Cm1 = num_classes - 1

    # Single layout pass: put batch on the lane (last) axis. Feature order is already
    # task-major, so a plain 2-D transpose suffices. Native dtype is kept (no host cast).
    logits_t = logits.T                                    # [T*(C-1), B]
    targets_t = targets.T                                  # [T*C,     B]

    # Tiny parameter prep (plain JAX): monotonic thresholds + normalized weights.
    thresholds = jnp.cumsum(jax.nn.softplus(raw_thresholds.astype(jnp.float32)), axis=-1)
    w_norm = weights.astype(jnp.float32) / jnp.sum(weights.astype(jnp.float32))   # (T,)

    # Batch tile: full batch when small, otherwise a lane-aligned tile
    # (double-buffered footprint ~ 2 * (T*(2C-1)) * 4B * block_b, well under the
    # default scoped-VMEM limit on v5e/v6e/v7x for block_b <= 32768).
    if B <= 128:
        block_b = B
    else:
        block_b = min(max_block_b, (B // 128) * 128)
    grid = (pl.cdiv(B, block_b),)

    kernel = functools.partial(_combined_ordinal_ce_kernel,
                               num_tasks, num_classes, B, block_b)
    total, dim_losses = pl.pallas_call(
        kernel,
        out_shape=(jax.ShapeDtypeStruct((1, 1), jnp.float32),
                   jax.ShapeDtypeStruct((1, num_tasks), jnp.float32)),
        grid_spec=pltpu.PrefetchScalarGridSpec(
            num_scalar_prefetch=0,
            grid=grid,
            in_specs=[
                pl.BlockSpec((num_tasks * Cm1, block_b), lambda i: (0, i)),
                pl.BlockSpec((num_tasks * num_classes, block_b), lambda i: (0, i)),
                pl.BlockSpec(memory_space=pltpu.MemorySpace.SMEM),   # thresholds (T, C-1)
                pl.BlockSpec(memory_space=pltpu.MemorySpace.SMEM),   # weights    (T,)
            ],
            out_specs=(
                pl.BlockSpec((1, 1), lambda i: (0, 0)),
                pl.BlockSpec((1, num_tasks), lambda i: (0, 0)),
            ),
            scratch_shapes=[
                pltpu.VMEM((num_tasks, block_b), jnp.float32),   # per-task loss_sum rows
                pltpu.VMEM((num_tasks, block_b), jnp.float32),   # per-task valid counts
            ],
        ),
        compiler_params=pltpu.CompilerParams(
            dimension_semantics=("arbitrary",),
        ),
    )(logits_t, targets_t, thresholds, w_norm)
    return total[0, 0], dim_losses[0]


def _reference(logits, targets, raw_thresholds, weights, num_classes, num_tasks):
    """Pure-JAX reference mirroring the PyTorch forward (compute in f32)."""
    logits = logits.astype(jnp.float32)
    targets = targets.astype(jnp.float32)
    Cm1 = num_classes - 1
    thresholds = jnp.cumsum(jax.nn.softplus(raw_thresholds.astype(jnp.float32)), axis=-1)
    dim_losses, masks = [], []
    for t in range(num_tasks):
        tt = targets[:, t * num_classes:(t + 1) * num_classes]
        tl = logits[:, t * Cm1:(t + 1) * Cm1]
        valid = ~jnp.any(jnp.isnan(tt), axis=1)
        idx = jnp.argmax(jnp.where(jnp.isnan(tt), -jnp.inf, tt), axis=1)
        y = (idx[:, None] > jnp.arange(Cm1)[None, :]).astype(jnp.float32)
        z = tl - thresholds[t][None, :]
        bce = jnp.maximum(z, 0.0) - z * y + jnp.log1p(jnp.exp(-jnp.abs(z)))
        cnt = jnp.sum(valid.astype(jnp.float32))
        loss = jnp.where(
            cnt > 0,
            jnp.sum(jnp.where(valid[:, None], bce, 0.0)) / jnp.maximum(cnt * Cm1, 1.0),
            0.0)
        dim_losses.append(loss)
        masks.append(cnt > 0)
    dim_losses = jnp.stack(dim_losses)
    mask = jnp.stack(masks)
    w = weights.astype(jnp.float32)
    w = w / jnp.sum(w)
    w = w * mask.astype(jnp.float32)
    ws = jnp.maximum(jnp.sum(w), 1e-8)
    dl = w * dim_losses
    return jnp.sum(dl) / ws, dl


if __name__ == "__main__":
    NUM_CLASSES = 5
    NUM_TASKS = 2

    def build(key, batch, dtype):
        k1, k2, k3, k4 = jax.random.split(key, 4)
        logits = jax.random.normal(
            k1, (batch, NUM_TASKS * (NUM_CLASSES - 1)), dtype=jnp.float32)
        class_idx = jax.random.randint(k2, (batch, NUM_TASKS), 0, NUM_CLASSES)
        targets = jax.nn.one_hot(class_idx, NUM_CLASSES, dtype=jnp.float32).reshape(
            batch, NUM_TASKS * NUM_CLASSES)
        # sprinkle NaN rows into task 1
        n_nan = max(1, batch // 4)
        nan_rows = jax.random.randint(k4, (n_nan,), 0, batch)
        targets = targets.at[nan_rows, NUM_CLASSES:2 * NUM_CLASSES].set(jnp.nan)
        raw_thresholds = jax.random.normal(
            k3, (NUM_TASKS, NUM_CLASSES - 1), dtype=jnp.float32) * 0.01
        weights = jnp.ones((NUM_TASKS,), jnp.float32)
        return logits.astype(dtype), targets.astype(dtype), raw_thresholds, weights

    def check(logits, targets, raw_thresholds, weights):
        total, dim_losses = combined_ordinal_ce_loss(
            logits, targets, raw_thresholds, weights, NUM_CLASSES, NUM_TASKS)
        total = jax.block_until_ready(total)
        dim_losses = jax.block_until_ready(dim_losses)
        ref_total, ref_dim = _reference(
            logits, targets, raw_thresholds, weights, NUM_CLASSES, NUM_TASKS)
        assert jnp.allclose(total, ref_total, rtol=1e-5, atol=1e-5), (total, ref_total)
        assert jnp.allclose(dim_losses, ref_dim, rtol=1e-5, atol=1e-5), (dim_losses, ref_dim)

    key = jax.random.PRNGKey(0)
    k1, k2 = jax.random.split(key)

    # small single-tile case (float32, B on lanes, grid=1)
    check(*build(k1, 8, jnp.float32))
    # multi-tile case: bf16 streaming, 2-step batch grid, partial (masked) last tile
    check(*build(k2, 300, jnp.bfloat16))

    print("KERNEL_OK")
</pallas_src>

<mosaic_0001>
module attributes {stable_mosaic.version = 11 : i64} {
  func.func @_combined_ordinal_ce_kernel(%arg0: i32, %arg1: memref<8x8xf32, #tpu.memory_space<vmem>>, %arg2: memref<10x8xf32, #tpu.memory_space<vmem>>, %arg3: memref<2x4xf32, #tpu.memory_space<smem>>, %arg4: memref<2xf32, #tpu.memory_space<smem>>, %arg5: memref<1x1xf32, #tpu.memory_space<vmem>>, %arg6: memref<1x2xf32, #tpu.memory_space<vmem>>, %arg7: memref<2x8xf32, #tpu.memory_space<vmem>>, %arg8: memref<2x8xf32, #tpu.memory_space<vmem>>) attributes {dimension_semantics = [#tpu.dimension_semantics<arbitrary>], iteration_bounds = array<i64: 1>, scalar_prefetch = 0 : i64, scratch_operands = 2 : i64, tpu.core_type = #tpu.core_type<tc>, window_params = [{transform_indices = @transform_0, window_bounds = array<i64: 8, 8>}, {transform_indices = @transform_1, window_bounds = array<i64: 10, 8>}, {transform_indices = @transform_2, window_bounds = array<i64: 2, 4>}, {transform_indices = @transform_3, window_bounds = array<i64: 2>}, {pipeline_mode = #tpu.pipeline_mode<synchronous>, transform_indices = @transform_4, window_bounds = array<i64: 1, 1>}, {pipeline_mode = #tpu.pipeline_mode<synchronous>, transform_indices = @transform_5, window_bounds = array<i64: 1, 2>}]} {
    %c0_i32 = arith.constant 0 : i32
    %0 = arith.cmpi eq, %arg0, %c0_i32 : i32
    %1 = arith.extui %0 : i1 to i32
    %c0_i32_0 = arith.constant 0 : i32
    %2 = arith.cmpi ne, %1, %c0_i32_0 : i32
    scf.if %2 {
      %cst_71 = arith.constant 0.000000e+00 : f32
      %252 = vector.broadcast %cst_71 : f32 to vector<2x8xf32>
      %c0_72 = arith.constant 0 : index
      %c0_73 = arith.constant 0 : index
      %253 = vector.load %arg7[%c0_72, %c0_73] : memref<2x8xf32, #tpu.memory_space<vmem>>, vector<2x8xf32>
      tpu.vector_store %arg7[%c0_72, %c0_73], %252 {strides = array<i32>} : memref<2x8xf32, #tpu.memory_space<vmem>>, vector<2x8xf32>,
      %cst_74 = arith.constant 0.000000e+00 : f32
      %254 = vector.broadcast %cst_74 : f32 to vector<2x8xf32>
      %c0_75 = arith.constant 0 : index
      %c0_76 = arith.constant 0 : index
      %255 = vector.load %arg8[%c0_75, %c0_76] : memref<2x8xf32, #tpu.memory_space<vmem>>, vector<2x8xf32>
      tpu.vector_store %arg8[%c0_75, %c0_76], %254 {strides = array<i32>} : memref<2x8xf32, #tpu.memory_space<vmem>>, vector<2x8xf32>,
    } else {
    }
    %3 = tpu.iota {dimensions = array<i32: 1>} : vector<1x8xi32>
    %c8_i32 = arith.constant 8 : i32
    %4 = arith.muli %arg0, %c8_i32 : i32
    %5 = vector.broadcast %4 : i32 to vector<1x8xi32>
    %6 = arith.addi %5, %3 : vector<1x8xi32>
    %c8_i32_1 = arith.constant 8 : i32
    %7 = vector.broadcast %c8_i32_1 : i32 to vector<1x8xi32>
    %8 = arith.cmpi slt, %6, %7 : vector<1x8xi32>
    %c0 = arith.constant 0 : index
    %c0_2 = arith.constant 0 : index
    %9 = vector.load %arg1[%c0, %c0_2] : memref<8x8xf32, #tpu.memory_space<vmem>>, vector<8x8xf32>
    %c0_3 = arith.constant 0 : index
    %c0_4 = arith.constant 0 : index
    %10 = vector.load %arg2[%c0_3, %c0_4] : memref<10x8xf32, #tpu.memory_space<vmem>>, vector<10x8xf32>
    %11 = vector.extract_strided_slice %10 {offsets = [0, 0], sizes = [1, 8], strides = [1, 1]} : vector<10x8xf32> to vector<1x8xf32>
    %12 = vector.extract_strided_slice %10 {offsets = [1, 0], sizes = [1, 8], strides = [1, 1]} : vector<10x8xf32> to vector<1x8xf32>
    %13 = vector.extract_strided_slice %10 {offsets = [2, 0], sizes = [1, 8], strides = [1, 1]} : vector<10x8xf32> to vector<1x8xf32>
    %14 = vector.extract_strided_slice %10 {offsets = [3, 0], sizes = [1, 8], strides = [1, 1]} : vector<10x8xf32> to vector<1x8xf32>
    %15 = vector.extract_strided_slice %10 {offsets = [4, 0], sizes = [1, 8], strides = [1, 1]} : vector<10x8xf32> to vector<1x8xf32>
    %16 = arith.cmpf one, %11, %11 : vector<1x8xf32>
    %c0_i32_5 = arith.constant 0 : i32
    %17 = vector.broadcast %c0_i32_5 : i32 to vector<1x8xi32>
    %18 = arith.cmpf one, %12, %12 : vector<1x8xf32>
    %19 = arith.ori %16, %18 : vector<1x8xi1>
    %20 = arith.cmpf ogt, %12, %11 : vector<1x8xf32>
    %21 = arith.select %20, %12, %11 : vector<1x8xi1>, vector<1x8xf32>
    %c1_i32 = arith.constant 1 : i32
    %22 = vector.broadcast %c1_i32 : i32 to vector<1x8xi32>
    %23 = arith.select %20, %22, %17 : vector<1x8xi1>, vector<1x8xi32>
    %24 = arith.cmpf one, %13, %13 : vector<1x8xf32>
    %25 = arith.ori %19, %24 : vector<1x8xi1>
    %26 = arith.cmpf ogt, %13, %21 : vector<1x8xf32>
    %27 = arith.select %26, %13, %21 : vector<1x8xi1>, vector<1x8xf32>
    %c2_i32 = arith.constant 2 : i32
    %28 = vector.broadcast %c2_i32 : i32 to vector<1x8xi32>
    %29 = arith.select %26, %28, %23 : vector<1x8xi1>, vector<1x8xi32>
    %30 = arith.cmpf one, %14, %14 : vector<1x8xf32>
    %31 = arith.ori %25, %30 : vector<1x8xi1>
    %32 = arith.cmpf ogt, %14, %27 : vector<1x8xf32>
    %33 = arith.select %32, %14, %27 : vector<1x8xi1>, vector<1x8xf32>
    %c3_i32 = arith.constant 3 : i32
    %34 = vector.broadcast %c3_i32 : i32 to vector<1x8xi32>
    %35 = arith.select %32, %34, %29 : vector<1x8xi1>, vector<1x8xi32>
    %36 = arith.cmpf one, %15, %15 : vector<1x8xf32>
    %37 = arith.ori %31, %36 : vector<1x8xi1>
    %38 = arith.cmpf ogt, %15, %33 : vector<1x8xf32>
    %c4_i32 = arith.constant 4 : i32
    %39 = vector.broadcast %c4_i32 : i32 to vector<1x8xi32>
    %40 = arith.select %38, %39, %35 : vector<1x8xi1>, vector<1x8xi32>
    %cst = arith.constant dense<true> : vector<1x8xi1>
    %41 = arith.xori %37, %cst : vector<1x8xi1>
    %42 = arith.andi %8, %41 : vector<1x8xi1>
    %cst_6 = arith.constant 0.000000e+00 : f32
    %43 = vector.broadcast %cst_6 : f32 to vector<1x8xf32>
    %44 = vector.extract_strided_slice %9 {offsets = [0, 0], sizes = [1, 8], strides = [1, 1]} : vector<8x8xf32> to vector<1x8xf32>
    %c0_7 = arith.constant 0 : index
    %c0_8 = arith.constant 0 : index
    %45 = memref.load %arg3[%c0_7, %c0_8] : memref<2x4xf32, #tpu.memory_space<smem>>
    %46 = vector.broadcast %45 : f32 to vector<1x8xf32>
    %47 = arith.subf %44, %46 : vector<1x8xf32>
    %c0_i32_9 = arith.constant 0 : i32
    %48 = vector.broadcast %c0_i32_9 : i32 to vector<1x8xi32>
    %49 = arith.cmpi sgt, %40, %48 : vector<1x8xi32>
    %50 = arith.extui %49 : vector<1x8xi1> to vector<1x8xi32>
    %51 = arith.sitofp %50 : vector<1x8xi32> to vector<1x8xf32>
    %cst_10 = arith.constant 0.000000e+00 : f32
    %52 = vector.broadcast %cst_10 : f32 to vector<1x8xf32>
    %53 = arith.maximumf %47, %52 : vector<1x8xf32>
    %54 = arith.mulf %47, %51 : vector<1x8xf32>
    %55 = arith.subf %53, %54 : vector<1x8xf32>
    %56 = math.absf %47 : vector<1x8xf32>
    %cst_11 = arith.constant 0.000000e+00 : f32
    %57 = vector.broadcast %cst_11 : f32 to vector<1x8xf32>
    %58 = arith.subf %57, %56 : vector<1x8xf32>
    %59 = math.exp %58 : vector<1x8xf32>
    %60 = math.log1p %59 : vector<1x8xf32>
    %61 = arith.addf %55, %60 : vector<1x8xf32>
    %62 = arith.addf %43, %61 : vector<1x8xf32>
    %63 = vector.extract_strided_slice %9 {offsets = [1, 0], sizes = [1, 8], strides = [1, 1]} : vector<8x8xf32> to vector<1x8xf32>
    %c0_12 = arith.constant 0 : index
    %c1 = arith.constant 1 : index
    %64 = memref.load %arg3[%c0_12, %c1] : memref<2x4xf32, #tpu.memory_space<smem>>
    %65 = vector.broadcast %64 : f32 to vector<1x8xf32>
    %66 = arith.subf %63, %65 : vector<1x8xf32>
    %c1_i32_13 = arith.constant 1 : i32
    %67 = vector.broadcast %c1_i32_13 : i32 to vector<1x8xi32>
    %68 = arith.cmpi sgt, %40, %67 : vector<1x8xi32>
    %69 = arith.extui %68 : vector<1x8xi1> to vector<1x8xi32>
    %70 = arith.sitofp %69 : vector<1x8xi32> to vector<1x8xf32>
    %cst_14 = arith.constant 0.000000e+00 : f32
    %71 = vector.broadcast %cst_14 : f32 to vector<1x8xf32>
    %72 = arith.maximumf %66, %71 : vector<1x8xf32>
    %73 = arith.mulf %66, %70 : vector<1x8xf32>
    %74 = arith.subf %72, %73 : vector<1x8xf32>
    %75 = math.absf %66 : vector<1x8xf32>
    %cst_15 = arith.constant 0.000000e+00 : f32
    %76 = vector.broadcast %cst_15 : f32 to vector<1x8xf32>
    %77 = arith.subf %76, %75 : vector<1x8xf32>
    %78 = math.exp %77 : vector<1x8xf32>
    %79 = math.log1p %78 : vector<1x8xf32>
    %80 = arith.addf %74, %79 : vector<1x8xf32>
    %81 = arith.addf %62, %80 : vector<1x8xf32>
    %82 = vector.extract_strided_slice %9 {offsets = [2, 0], sizes = [1, 8], strides = [1, 1]} : vector<8x8xf32> to vector<1x8xf32>
    %c0_16 = arith.constant 0 : index
    %c2 = arith.constant 2 : index
    %83 = memref.load %arg3[%c0_16, %c2] : memref<2x4xf32, #tpu.memory_space<smem>>
    %84 = vector.broadcast %83 : f32 to vector<1x8xf32>
    %85 = arith.subf %82, %84 : vector<1x8xf32>
    %c2_i32_17 = arith.constant 2 : i32
    %86 = vector.broadcast %c2_i32_17 : i32 to vector<1x8xi32>
    %87 = arith.cmpi sgt, %40, %86 : vector<1x8xi32>
    %88 = arith.extui %87 : vector<1x8xi1> to vector<1x8xi32>
    %89 = arith.sitofp %88 : vector<1x8xi32> to vector<1x8xf32>
    %cst_18 = arith.constant 0.000000e+00 : f32
    %90 = vector.broadcast %cst_18 : f32 to vector<1x8xf32>
    %91 = arith.maximumf %85, %90 : vector<1x8xf32>
    %92 = arith.mulf %85, %89 : vector<1x8xf32>
    %93 = arith.subf %91, %92 : vector<1x8xf32>
    %94 = math.absf %85 : vector<1x8xf32>
    %cst_19 = arith.constant 0.000000e+00 : f32
    %95 = vector.broadcast %cst_19 : f32 to vector<1x8xf32>
    %96 = arith.subf %95, %94 : vector<1x8xf32>
    %97 = math.exp %96 : vector<1x8xf32>
    %98 = math.log1p %97 : vector<1x8xf32>
    %99 = arith.addf %93, %98 : vector<1x8xf32>
    %100 = arith.addf %81, %99 : vector<1x8xf32>
    %101 = vector.extract_strided_slice %9 {offsets = [3, 0], sizes = [1, 8], strides = [1, 1]} : vector<8x8xf32> to vector<1x8xf32>
    %c0_20 = arith.constant 0 : index
    %c3 = arith.constant 3 : index
    %102 = memref.load %arg3[%c0_20, %c3] : memref<2x4xf32, #tpu.memory_space<smem>>
    %103 = vector.broadcast %102 : f32 to vector<1x8xf32>
    %104 = arith.subf %101, %103 : vector<1x8xf32>
    %c3_i32_21 = arith.constant 3 : i32
    %105 = vector.broadcast %c3_i32_21 : i32 to vector<1x8xi32>
    %106 = arith.cmpi sgt, %40, %105 : vector<1x8xi32>
    %107 = arith.extui %106 : vector<1x8xi1> to vector<1x8xi32>
    %108 = arith.sitofp %107 : vector<1x8xi32> to vector<1x8xf32>
    %cst_22 = arith.constant 0.000000e+00 : f32
    %109 = vector.broadcast %cst_22 : f32 to vector<1x8xf32>
    %110 = arith.maximumf %104, %109 : vector<1x8xf32>
    %111 = arith.mulf %104, %108 : vector<1x8xf32>
    %112 = arith.subf %110, %111 : vector<1x8xf32>
    %113 = math.absf %104 : vector<1x8xf32>
    %cst_23 = arith.constant 0.000000e+00 : f32
    %114 = vector.broadcast %cst_23 : f32 to vector<1x8xf32>
    %115 = arith.subf %114, %113 : vector<1x8xf32>
    %116 = math.exp %115 : vector<1x8xf32>
    %117 = math.log1p %116 : vector<1x8xf32>
    %118 = arith.addf %112, %117 : vector<1x8xf32>
    %119 = arith.addf %100, %118 : vector<1x8xf32>
    %c0_24 = arith.constant 0 : index
    %c0_25 = arith.constant 0 : index
    %120 = vector.load %arg7[%c0_24, %c0_25] : memref<2x8xf32, #tpu.memory_space<vmem>>, vector<1x8xf32>
    %cst_26 = arith.constant 0.000000e+00 : f32
    %121 = vector.broadcast %cst_26 : f32 to vector<1x8xf32>
    %122 = arith.select %42, %119, %121 : vector<1x8xi1>, vector<1x8xf32>
    %123 = arith.addf %120, %122 : vector<1x8xf32>
    %c0_27 = arith.constant 0 : index
    %c0_28 = arith.constant 0 : index
    %124 = vector.load %arg7[%c0_27, %c0_28] : memref<2x8xf32, #tpu.memory_space<vmem>>, vector<1x8xf32>
    tpu.vector_store %arg7[%c0_27, %c0_28], %123 {strides = array<i32>} : memref<2x8xf32, #tpu.memory_space<vmem>>, vector<1x8xf32>,
    %c0_29 = arith.constant 0 : index
    %c0_30 = arith.constant 0 : index
    %125 = vector.load %arg8[%c0_29, %c0_30] : memref<2x8xf32, #tpu.memory_space<vmem>>, vector<1x8xf32>
    %126 = arith.extui %42 : vector<1x8xi1> to vector<1x8xi32>
    %127 = arith.sitofp %126 : vector<1x8xi32> to vector<1x8xf32>
    %128 = arith.addf %125, %127 : vector<1x8xf32>
    %c0_31 = arith.constant 0 : index
    %c0_32 = arith.constant 0 : index
    %129 = vector.load %arg8[%c0_31, %c0_32] : memref<2x8xf32, #tpu.memory_space<vmem>>, vector<1x8xf32>
    tpu.vector_store %arg8[%c0_31, %c0_32], %128 {strides = array<i32>} : memref<2x8xf32, #tpu.memory_space<vmem>>, vector<1x8xf32>,
    %130 = vector.extract_strided_slice %10 {offsets = [5, 0], sizes = [1, 8], strides = [1, 1]} : vector<10x8xf32> to vector<1x8xf32>
    %131 = vector.extract_strided_slice %10 {offsets = [6, 0], sizes = [1, 8], strides = [1, 1]} : vector<10x8xf32> to vector<1x8xf32>
    %132 = vector.extract_strided_slice %10 {offsets = [7, 0], sizes = [1, 8], strides = [1, 1]} : vector<10x8xf32> to vector<1x8xf32>
    %133 = vector.extract_strided_slice %10 {offsets = [8, 0], sizes = [1, 8], strides = [1, 1]} : vector<10x8xf32> to vector<1x8xf32>
    %134 = vector.extract_strided_slice %10 {offsets = [9, 0], sizes = [1, 8], strides = [1, 1]} : vector<10x8xf32> to vector<1x8xf32>
    %135 = arith.cmpf one, %130, %130 : vector<1x8xf32>
    %c0_i32_33 = arith.constant 0 : i32
    %136 = vector.broadcast %c0_i32_33 : i32 to vector<1x8xi32>
    %137 = arith.cmpf one, %131, %131 : vector<1x8xf32>
    %138 = arith.ori %135, %137 : vector<1x8xi1>
    %139 = arith.cmpf ogt, %131, %130 : vector<1x8xf32>
    %140 = arith.select %139, %131, %130 : vector<1x8xi1>, vector<1x8xf32>
    %c1_i32_34 = arith.constant 1 : i32
    %141 = vector.broadcast %c1_i32_34 : i32 to vector<1x8xi32>
    %142 = arith.select %139, %141, %136 : vector<1x8xi1>, vector<1x8xi32>
    %143 = arith.cmpf one, %132, %132 : vector<1x8xf32>
    %144 = arith.ori %138, %143 : vector<1x8xi1>
    %145 = arith.cmpf ogt, %132, %140 : vector<1x8xf32>
    %146 = arith.select %145, %132, %140 : vector<1x8xi1>, vector<1x8xf32>
    %c2_i32_35 = arith.constant 2 : i32
    %147 = vector.broadcast %c2_i32_35 : i32 to vector<1x8xi32>
    %148 = arith.select %145, %147, %142 : vector<1x8xi1>, vector<1x8xi32>
    %149 = arith.cmpf one, %133, %133 : vector<1x8xf32>
    %150 = arith.ori %144, %149 : vector<1x8xi1>
    %151 = arith.cmpf ogt, %133, %146 : vector<1x8xf32>
    %152 = arith.select %151, %133, %146 : vector<1x8xi1>, vector<1x8xf32>
    %c3_i32_36 = arith.constant 3 : i32
    %153 = vector.broadcast %c3_i32_36 : i32 to vector<1x8xi32>
    %154 = arith.select %151, %153, %148 : vector<1x8xi1>, vector<1x8xi32>
    %155 = arith.cmpf one, %134, %134 : vector<1x8xf32>
    %156 = arith.ori %150, %155 : vector<1x8xi1>
    %157 = arith.cmpf ogt, %134, %152 : vector<1x8xf32>
    %c4_i32_37 = arith.constant 4 : i32
    %158 = vector.broadcast %c4_i32_37 : i32 to vector<1x8xi32>
    %159 = arith.select %157, %158, %154 : vector<1x8xi1>, vector<1x8xi32>
    %cst_38 = arith.constant dense<true> : vector<1x8xi1>
    %160 = arith.xori %156, %cst_38 : vector<1x8xi1>
    %161 = arith.andi %8, %160 : vector<1x8xi1>
    %cst_39 = arith.constant 0.000000e+00 : f32
    %162 = vector.broadcast %cst_39 : f32 to vector<1x8xf32>
    %163 = vector.extract_strided_slice %9 {offsets = [4, 0], sizes = [1, 8], strides = [1, 1]} : vector<8x8xf32> to vector<1x8xf32>
    %c1_40 = arith.constant 1 : index
    %c0_41 = arith.constant 0 : index
    %164 = memref.load %arg3[%c1_40, %c0_41] : memref<2x4xf32, #tpu.memory_space<smem>>
    %165 = vector.broadcast %164 : f32 to vector<1x8xf32>
    %166 = arith.subf %163, %165 : vector<1x8xf32>
    %c0_i32_42 = arith.constant 0 : i32
    %167 = vector.broadcast %c0_i32_42 : i32 to vector<1x8xi32>
    %168 = arith.cmpi sgt, %159, %167 : vector<1x8xi32>
    %169 = arith.extui %168 : vector<1x8xi1> to vector<1x8xi32>
    %170 = arith.sitofp %169 : vector<1x8xi32> to vector<1x8xf32>
    %cst_43 = arith.constant 0.000000e+00 : f32
    %171 = vector.broadcast %cst_43 : f32 to vector<1x8xf32>
    %172 = arith.maximumf %166, %171 : vector<1x8xf32>
    %173 = arith.mulf %166, %170 : vector<1x8xf32>
    %174 = arith.subf %172, %173 : vector<1x8xf32>
    %175 = math.absf %166 : vector<1x8xf32>
    %cst_44 = arith.constant 0.000000e+00 : f32
    %176 = vector.broadcast %cst_44 : f32 to vector<1x8xf32>
    %177 = arith.subf %176, %175 : vector<1x8xf32>
    %178 = math.exp %177 : vector<1x8xf32>
    %179 = math.log1p %178 : vector<1x8xf32>
    %180 = arith.addf %174, %179 : vector<1x8xf32>
    %181 = arith.addf %162, %180 : vector<1x8xf32>
    %182 = vector.extract_strided_slice %9 {offsets = [5, 0], sizes = [1, 8], strides = [1, 1]} : vector<8x8xf32> to vector<1x8xf32>
    %c1_45 = arith.constant 1 : index
    %c1_46 = arith.constant 1 : index
    %183 = memref.load %arg3[%c1_45, %c1_46] : memref<2x4xf32, #tpu.memory_space<smem>>
    %184 = vector.broadcast %183 : f32 to vector<1x8xf32>
    %185 = arith.subf %182, %184 : vector<1x8xf32>
    %c1_i32_47 = arith.constant 1 : i32
    %186 = vector.broadcast %c1_i32_47 : i32 to vector<1x8xi32>
    %187 = arith.cmpi sgt, %159, %186 : vector<1x8xi32>
    %188 = arith.extui %187 : vector<1x8xi1> to vector<1x8xi32>
    %189 = arith.sitofp %188 : vector<1x8xi32> to vector<1x8xf32>
    %cst_48 = arith.constant 0.000000e+00 : f32
    %190 = vector.broadcast %cst_48 : f32 to vector<1x8xf32>
    %191 = arith.maximumf %185, %190 : vector<1x8xf32>
    %192 = arith.mulf %185, %189 : vector<1x8xf32>
    %193 = arith.subf %191, %192 : vector<1x8xf32>
    %194 = math.absf %185 : vector<1x8xf32>
    %cst_49 = arith.constant 0.000000e+00 : f32
    %195 = vector.broadcast %cst_49 : f32 to vector<1x8xf32>
    %196 = arith.subf %195, %194 : vector<1x8xf32>
    %197 = math.exp %196 : vector<1x8xf32>
    %198 = math.log1p %197 : vector<1x8xf32>
    %199 = arith.addf %193, %198 : vector<1x8xf32>
    %200 = arith.addf %181, %199 : vector<1x8xf32>
    %201 = vector.extract_strided_slice %9 {offsets = [6, 0], sizes = [1, 8], strides = [1, 1]} : vector<8x8xf32> to vector<1x8xf32>
    %c1_50 = arith.constant 1 : index
    %c2_51 = arith.constant 2 : index
    %202 = memref.load %arg3[%c1_50, %c2_51] : memref<2x4xf32, #tpu.memory_space<smem>>
    %203 = vector.broadcast %202 : f32 to vector<1x8xf32>
    %204 = arith.subf %201, %203 : vector<1x8xf32>
    %c2_i32_52 = arith.constant 2 : i32
    %205 = vector.broadcast %c2_i32_52 : i32 to vector<1x8xi32>
    %206 = arith.cmpi sgt, %159, %205 : vector<1x8xi32>
    %207 = arith.extui %206 : vector<1x8xi1> to vector<1x8xi32>
    %208 = arith.sitofp %207 : vector<1x8xi32> to vector<1x8xf32>
    %cst_53 = arith.constant 0.000000e+00 : f32
    %209 = vector.broadcast %cst_53 : f32 to vector<1x8xf32>
    %210 = arith.maximumf %204, %209 : vector<1x8xf32>
    %211 = arith.mulf %204, %208 : vector<1x8xf32>
    %212 = arith.subf %210, %211 : vector<1x8xf32>
    %213 = math.absf %204 : vector<1x8xf32>
    %cst_54 = arith.constant 0.000000e+00 : f32
    %214 = vector.broadcast %cst_54 : f32 to vector<1x8xf32>
    %215 = arith.subf %214, %213 : vector<1x8xf32>
    %216 = math.exp %215 : vector<1x8xf32>
    %217 = math.log1p %216 : vector<1x8xf32>
    %218 = arith.addf %212, %217 : vector<1x8xf32>
    %219 = arith.addf %200, %218 : vector<1x8xf32>
    %220 = vector.extract_strided_slice %9 {offsets = [7, 0], sizes = [1, 8], strides = [1, 1]} : vector<8x8xf32> to vector<1x8xf32>
    %c1_55 = arith.constant 1 : index
    %c3_56 = arith.constant 3 : index
    %221 = memref.load %arg3[%c1_55, %c3_56] : memref<2x4xf32, #tpu.memory_space<smem>>
    %222 = vector.broadcast %221 : f32 to vector<1x8xf32>
    %223 = arith.subf %220, %222 : vector<1x8xf32>
    %c3_i32_57 = arith.constant 3 : i32
    %224 = vector.broadcast %c3_i32_57 : i32 to vector<1x8xi32>
    %225 = arith.cmpi sgt, %159, %224 : vector<1x8xi32>
    %226 = arith.extui %225 : vector<1x8xi1> to vector<1x8xi32>
    %227 = arith.sitofp %226 : vector<1x8xi32> to vector<1x8xf32>
    %cst_58 = arith.constant 0.000000e+00 : f32
    %228 = vector.broadcast %cst_58 : f32 to vector<1x8xf32>
    %229 = arith.maximumf %223, %228 : vector<1x8xf32>
    %230 = arith.mulf %223, %227 : vector<1x8xf32>
    %231 = arith.subf %229, %230 : vector<1x8xf32>
    %232 = math.absf %223 : vector<1x8xf32>
    %cst_59 = arith.constant 0.000000e+00 : f32
    %233 = vector.broadcast %cst_59 : f32 to vector<1x8xf32>
    %234 = arith.subf %233, %232 : vector<1x8xf32>
    %235 = math.exp %234 : vector<1x8xf32>
    %236 = math.log1p %235 : vector<1x8xf32>
    %237 = arith.addf %231, %236 : vector<1x8xf32>
    %238 = arith.addf %219, %237 : vector<1x8xf32>
    %c1_60 = arith.constant 1 : index
    %c0_61 = arith.constant 0 : index
    %239 = vector.load %arg7[%c1_60, %c0_61] : memref<2x8xf32, #tpu.memory_space<vmem>>, vector<1x8xf32>
    %cst_62 = arith.constant 0.000000e+00 : f32
    %240 = vector.broadcast %cst_62 : f32 to vector<1x8xf32>
    %241 = arith.select %161, %238, %240 : vector<1x8xi1>, vector<1x8xf32>
    %242 = arith.addf %239, %241 : vector<1x8xf32>
    %c1_63 = arith.constant 1 : index
    %c0_64 = arith.constant 0 : index
    %243 = vector.load %arg7[%c1_63, %c0_64] : memref<2x8xf32, #tpu.memory_space<vmem>>, vector<1x8xf32>
    tpu.vector_store %arg7[%c1_63, %c0_64], %242 {strides = array<i32>} : memref<2x8xf32, #tpu.memory_space<vmem>>, vector<1x8xf32>,
    %c1_65 = arith.constant 1 : index
    %c0_66 = arith.constant 0 : index
    %244 = vector.load %arg8[%c1_65, %c0_66] : memref<2x8xf32, #tpu.memory_space<vmem>>, vector<1x8xf32>
    %245 = arith.extui %161 : vector<1x8xi1> to vector<1x8xi32>
    %246 = arith.sitofp %245 : vector<1x8xi32> to vector<1x8xf32>
    %247 = arith.addf %244, %246 : vector<1x8xf32>
    %c1_67 = arith.constant 1 : index
    %c0_68 = arith.constant 0 : index
    %248 = vector.load %arg8[%c1_67, %c0_68] : memref<2x8xf32, #tpu.memory_space<vmem>>, vector<1x8xf32>
    tpu.vector_store %arg8[%c1_67, %c0_68], %247 {strides = array<i32>} : memref<2x8xf32, #tpu.memory_space<vmem>>, vector<1x8xf32>,
    %c0_i32_69 = arith.constant 0 : i32
    %249 = arith.cmpi eq, %arg0, %c0_i32_69 : i32
    %250 = arith.extui %249 : i1 to i32
    %c0_i32_70 = arith.constant 0 : i32
    %251 = arith.cmpi ne, %250, %c0_i32_70 : i32
    scf.if %251 {
      %252 = tpu.iota {dimensions = array<i32: 1>} : vector<1x2xi32>
      %cst_71 = arith.constant 0.000000e+00 : f32
      %253 = vector.broadcast %cst_71 : f32 to vector<1x2xf32>
      %cst_72 = arith.constant 0.000000e+00 : f32
      %254 = vector.broadcast %cst_72 : f32 to vector<1x1xf32>
      %cst_73 = arith.constant 0.000000e+00 : f32
      %255 = vector.broadcast %cst_73 : f32 to vector<1x1xf32>
      %c0_74 = arith.constant 0 : index
      %c0_75 = arith.constant 0 : index
      %256 = vector.load %arg7[%c0_74, %c0_75] : memref<2x8xf32, #tpu.memory_space<vmem>>, vector<1x8xf32>
      %cst_76 = arith.constant dense<0.000000e+00> : vector<1xf32>
      %257 = vector.multi_reduction <add>, %256, %cst_76 [1] : vector<1x8xf32> to vector<1xf32>
      %258 = vector.shape_cast %257 : vector<1xf32> to vector<1x1xf32>
      %c0_77 = arith.constant 0 : index
      %c0_78 = arith.constant 0 : index
      %259 = vector.load %arg8[%c0_77, %c0_78] : memref<2x8xf32, #tpu.memory_space<vmem>>, vector<1x8xf32>
      %cst_79 = arith.constant dense<0.000000e+00> : vector<1xf32>
      %260 = vector.multi_reduction <add>, %259, %cst_79 [1] : vector<1x8xf32> to vector<1xf32>
      %261 = vector.shape_cast %260 : vector<1xf32> to vector<1x1xf32>
      %cst_80 = arith.constant 4.000000e+00 : f32
      %262 = vector.broadcast %cst_80 : f32 to vector<1x1xf32>
      %263 = arith.mulf %261, %262 : vector<1x1xf32>
      %cst_81 = arith.constant 1.000000e+00 : f32
      %264 = vector.broadcast %cst_81 : f32 to vector<1x1xf32>
      %265 = arith.maximumf %263, %264 : vector<1x1xf32>
      %cst_82 = arith.constant 0.000000e+00 : f32
      %266 = vector.broadcast %cst_82 : f32 to vector<1x1xf32>
      %267 = arith.cmpf ogt, %261, %266 : vector<1x1xf32>
      %268 = arith.divf %258, %265 : vector<1x1xf32>
      %cst_83 = arith.constant 0.000000e+00 : f32
      %269 = vector.broadcast %cst_83 : f32 to vector<1x1xf32>
      %270 = arith.select %267, %268, %269 : vector<1x1xi1>, vector<1x1xf32>
      %c0_84 = arith.constant 0 : index
      %271 = memref.load %arg4[%c0_84] : memref<2xf32, #tpu.memory_space<smem>>
      %cst_85 = arith.constant 0.000000e+00 : f32
      %272 = vector.broadcast %271 : f32 to vector<1x1xf32>
      %273 = vector.broadcast %cst_85 : f32 to vector<1x1xf32>
      %274 = arith.select %267, %272, %273 : vector<1x1xi1>, vector<1x1xf32>
      %275 = arith.mulf %274, %270 : vector<1x1xf32>
      %c0_i32_86 = arith.constant 0 : i32
      %276 = vector.broadcast %c0_i32_86 : i32 to vector<1x2xi32>
      %277 = arith.cmpi eq, %252, %276 : vector<1x2xi32>
      %278 = vector.shape_cast %275 : vector<1x1xf32> to vector<1x1xf32>
      %279 = vector.broadcast %278 : vector<1x1xf32> to vector<1x2xf32>
      %280 = arith.select %277, %279, %253 : vector<1x2xi1>, vector<1x2xf32>
      %281 = arith.addf %254, %275 : vector<1x1xf32>
      %282 = arith.addf %255, %274 : vector<1x1xf32>
      %c1_87 = arith.constant 1 : index
      %c0_88 = arith.constant 0 : index
      %283 = vector.load %arg7[%c1_87, %c0_88] : memref<2x8xf32, #tpu.memory_space<vmem>>, vector<1x8xf32>
      %cst_89 = arith.constant dense<0.000000e+00> : vector<1xf32>
      %284 = vector.multi_reduction <add>, %283, %cst_89 [1] : vector<1x8xf32> to vector<1xf32>
      %285 = vector.shape_cast %284 : vector<1xf32> to vector<1x1xf32>
      %c1_90 = arith.constant 1 : index
      %c0_91 = arith.constant 0 : index
      %286 = vector.load %arg8[%c1_90, %c0_91] : memref<2x8xf32, #tpu.memory_space<vmem>>, vector<1x8xf32>
      %cst_92 = arith.constant dense<0.000000e+00> : vector<1xf32>
      %287 = vector.multi_reduction <add>, %286, %cst_92 [1] : vector<1x8xf32> to vector<1xf32>
      %288 = vector.shape_cast %287 : vector<1xf32> to vector<1x1xf32>
      %cst_93 = arith.constant 4.000000e+00 : f32
      %289 = vector.broadcast %cst_93 : f32 to vector<1x1xf32>
      %290 = arith.mulf %288, %289 : vector<1x1xf32>
      %cst_94 = arith.constant 1.000000e+00 : f32
      %291 = vector.broadcast %cst_94 : f32 to vector<1x1xf32>
      %292 = arith.maximumf %290, %291 : vector<1x1xf32>
      %cst_95 = arith.constant 0.000000e+00 : f32
      %293 = vector.broadcast %cst_95 : f32 to vector<1x1xf32>
      %294 = arith.cmpf ogt, %288, %293 : vector<1x1xf32>
      %295 = arith.divf %285, %292 : vector<1x1xf32>
      %cst_96 = arith.constant 0.000000e+00 : f32
      %296 = vector.broadcast %cst_96 : f32 to vector<1x1xf32>
      %297 = arith.select %294, %295, %296 : vector<1x1xi1>, vector<1x1xf32>
      %c1_97 = arith.constant 1 : index
      %298 = memref.load %arg4[%c1_97] : memref<2xf32, #tpu.memory_space<smem>>
      %cst_98 = arith.constant 0.000000e+00 : f32
      %299 = vector.broadcast %298 : f32 to vector<1x1xf32>
      %300 = vector.broadcast %cst_98 : f32 to vector<1x1xf32>
      %301 = arith.select %294, %299, %300 : vector<1x1xi1>, vector<1x1xf32>
      %302 = arith.mulf %301, %297 : vector<1x1xf32>
      %c1_i32_99 = arith.constant 1 : i32
      %303 = vector.broadcast %c1_i32_99 : i32 to vector<1x2xi32>
      %304 = arith.cmpi eq, %252, %303 : vector<1x2xi32>
      %305 = vector.shape_cast %302 : vector<1x1xf32> to vector<1x1xf32>
      %306 = vector.broadcast %305 : vector<1x1xf32> to vector<1x2xf32>
      %307 = arith.select %304, %306, %280 : vector<1x2xi1>, vector<1x2xf32>
      %308 = arith.addf %281, %302 : vector<1x1xf32>
      %309 = arith.addf %282, %301 : vector<1x1xf32>
      %c0_100 = arith.constant 0 : index
      %c0_101 = arith.constant 0 : index
      %310 = vector.load %arg6[%c0_100, %c0_101] : memref<1x2xf32, #tpu.memory_space<vmem>>, vector<1x2xf32>
      tpu.vector_store %arg6[%c0_100, %c0_101], %307 {strides = array<i32>} : memref<1x2xf32, #tpu.memory_space<vmem>>, vector<1x2xf32>,
      %cst_102 = arith.constant 9.99999993E-9 : f32
      %311 = vector.broadcast %cst_102 : f32 to vector<1x1xf32>
      %312 = arith.maximumf %309, %311 : vector<1x1xf32>
      %313 = arith.divf %308, %312 : vector<1x1xf32>
      %c0_103 = arith.constant 0 : index
      %c0_104 = arith.constant 0 : index
      %314 = vector.load %arg5[%c0_103, %c0_104] : memref<1x1xf32, #tpu.memory_space<vmem>>, vector<1x1xf32>
      tpu.vector_store %arg5[%c0_103, %c0_104], %313 {strides = array<i32>} : memref<1x1xf32, #tpu.memory_space<vmem>>, vector<1x1xf32>,
    } else {
    }
    return
  }
  func.func @transform_0(%arg0: i32) -> (i32, i32) {
    %c0_i32 = arith.constant 0 : i32
    %c0_i32_0 = arith.constant 0 : i32
    return %c0_i32, %arg0 : i32, i32
  }
  func.func @transform_1(%arg0: i32) -> (i32, i32) {
    %c0_i32 = arith.constant 0 : i32
    %c0_i32_0 = arith.constant 0 : i32
    return %c0_i32, %arg0 : i32, i32
  }
  func.func @transform_2(%arg0: i32) -> (i32, i32) {
    %c0_i32 = arith.constant 0 : i32
    %c0_i32_0 = arith.constant 0 : i32
    %c0_i32_1 = arith.constant 0 : i32
    return %c0_i32, %c0_i32_0 : i32, i32
  }
  func.func @transform_3(%arg0: i32) -> i32 {
    %c0_i32 = arith.constant 0 : i32
    %c0_i32_0 = arith.constant 0 : i32
    return %c0_i32 : i32
  }
  func.func @transform_4(%arg0: i32) -> (i32, i32) {
    %c0_i32 = arith.constant 0 : i32
    %c0_i32_0 = arith.constant 0 : i32
    %c0_i32_1 = arith.constant 0 : i32
    return %c0_i32, %c0_i32_0 : i32, i32
  }
  func.func @transform_5(%arg0: i32) -> (i32, i32) {
    %c0_i32 = arith.constant 0 : i32
    %c0_i32_0 = arith.constant 0 : i32
    %c0_i32_1 = arith.constant 0 : i32
    return %c0_i32, %c0_i32_0 : i32, i32
  }
}

</mosaic_0001>

<bundles_post_ra>
// kernel: tpu_custom_call.1
= control target key start
LH: loop header
LB: loop body
LE: loop exit
PB: predicated region body
PF: predicated region fallthrough
CT: control target
= control target key end

     0   :  { %11 = vsyncpa [#allocation6], 0  ;;  %s947_s0 = inlined_call_operand.vmem [shape: f32[8,8], index: 0, kind: input, shape index: {}]   ;;  %s948_s1 = inlined_call_operand.vmem [shape: f32[10,8], index: 1, kind: input, shape index: {}]   ;;  %s949_s2 = inlined_call_operand.vmem [shape: f32[2,4], index: 2, kind: input, shape index: {}]   ;;  %s950_s3 = inlined_call_operand.vmem [shape: f32[2], index: 3, kind: input, shape index: {}]   ;;  %s951_s4 = inlined_call_operand.hbm [shape: f32[1,1], index: 4, kind: output, shape index: {0}]   ;;  %s952_s5 = inlined_call_operand.hbm [shape: f32[1,2], index: 5, kind: output, shape index: {1}]  }
   0x1   :  { %12 = vsyncpa [#allocation8], 0 }
   0x2   :  { %13 = vsyncpa [#allocation5], 0 }
   0x3   :  { %14 = vsyncpa [#allocation11], 0  ;;  %s25_s20 = sshll.u32 %s949_s2, 4  ;;  %s35_s23 = sshll.u32 %s950_s3, 4  ;;  %s26_s20 = int_to_ptr.vmem [resolvable:$true] %s25_s20  ;;  %s36_s23 = int_to_ptr.vmem [resolvable:$true] %s35_s23 }
   0x4   :  { %s532_s24 = scalar_lea.vmem %s26_s20, 32  ;;  %p537_p1 = scmp.lt.s32.totalorder %s26_s20, %s26_s20 }
   0x5   :  { %p533_p0 = scmp.ne.s32.totalorder %s26_s20, %s532_s24  ;;  %p538_p2 = scmp.lt.s32.totalorder %s532_s24, %s532_s24 }
   0x7   :  { %p539_p3 = por %p538_p2, %p537_p1 }
   0x9   :  { %p540_p4 = pnand %p539_p3, %p533_p0 }
   0xb   :  { %543 = shalt.err (!%p540_p4)
}
   0xc   :  { %s608_s25 = smov [#allocation4]   ;;  %s544_s26 = scalar_lea.vmem %s36_s23, 16 }
   0xd   :  { %28 = dma.vmem_to_smem %s26_s20, 32, %s608_s25, [#allocation6]  }
   0xe   :  { %p545_p5 = scmp.ne.s32.totalorder %s36_s23, %s544_s26  ;;  %p549_p6 = scmp.lt.s32.totalorder %s36_s23, %s36_s23 }
   0xf   :  { %p550_p7 = scmp.lt.s32.totalorder %s544_s26, %s544_s26 }
  0x11   :  { %p551_p8 = por %p550_p7, %p549_p6 }
  0x13   :  { %p552_p9 = pnand %p551_p8, %p545_p5 }
  0x15   :  { %555 = shalt.err (!%p552_p9)
}
  0x16   :  { %s609_s2 = smov [#allocation7]  }
  0x17   :  { %38 = dma.vmem_to_smem %s36_s23, 16, %s609_s2, [#allocation8]  }
  0x18   :  { %600 = dma.done.wait [#allocation6], 32  }
  0x19   :  { %601 = vsyncadd [#allocation6], 4294967264 }
  0x1a   :  { %602 = dma.done.wait [#allocation8], 16  }
  0x1b   :  { %603 = vsyncadd [#allocation8], 4294967280 }
  0x1c   :  { %45 = sfence }
  0x1d   :  { %vm50_vm0 = vcmask 58368   ;;  %v53_v0 = vlaneseq  ;;  %v654_v1 = vld [vmem:[%s948_s1] sm:$0xff]  ;;  %v610_v2 = vmov 0.0   ;;  %s660_s28 = sld [smem:[#allocation4]]  ;;  %v611_v5 = vmov 0   ;;  %s668_s29 = sld [smem:[#allocation4 + $0x1]] }
  0x1e   :  { %52 = vst.msk [vmem:[#allocation3] sm:$0x3] %vm50_vm0, %v610_v2  ;;  %vm62_vm1 = vcmp.ne.f32.partialorder %v654_v1, %v654_v1  ;;  %v68_v3 = vrot.slane %v654_v1, 7  ;;  %51 = vst.msk [vmem:[#allocation2] sm:$0x3] %vm50_vm0, %v610_v2  ;;  %s670_s30 = sld [smem:[#allocation4 + $0x2]] }
  0x1f   :  { %v663_v4 = vand.u32 127, %v53_v0  ;;  %v63_v6 = vsel %vm62_vm1, 1, %v611_v5  ;;  %s673_s6 = sld [smem:[#allocation4 + $0x3]]  ;;  %v683_v16 = vld [vmem:[%s947_s0] sm:$0xff]  ;;  %v706_v20 = vld [vmem:[%s948_s1 + $0x8] sm:$0x3] }
  0x20   :  { %v64_v7 = vrot.slane %v63_v6, 1  ;;  %vm70_vm2 = vcmp.gt.f32.partialorder %v654_v1, %v68_v3  ;;  %v73_v8 = vrot.slane %v63_v6, 2  ;;  %v83_v9 = vrot.slane %v63_v6, 3  ;;  %s760_s1 = sld [smem:[#allocation4 + $0x80]]  ;;  %s765_s10 = sld [smem:[#allocation4 + $0x81]] }
  0x21   :  { %v71_v10 = vsel %vm70_vm2, %v654_v1, %v68_v3  ;;  %v72_v11 = vsel %vm70_vm2, 1, %v611_v5  ;;  %v93_v12 = vrot.slane %v63_v6, 4  ;;  %vm58_vm8 = vcmp.lt.s32.totalorder %v663_v4, 8  ;;  %s767_s11 = sld [smem:[#allocation4 + $0x82]]  ;;  %s801_s12 = sld [smem:[#allocation4 + $0x83]] }
  0x22   :  { %vm65_vm3 = vcmp.ne.s32.totalorder %v64_v7, 0  ;;  %vm676_vm4 = vcmp.ne.s32.totalorder %v73_v8, 0  ;;  %v77_v14 = vrot.slane %v71_v10, 7  ;;  %v81_v15 = vrot.slane %v72_v11, 7  ;;  %s402_s13 = sld [smem:[#allocation7]]  ;;  %s486_s14 = sld [smem:[#allocation7 + $0x1]] }
  0x23   :  { %vm688_vm5 = vmor %vm62_vm1, %vm65_vm3  ;;  %vm84_vm6 = vcmp.ne.s32.totalorder %v83_v9, 0  ;;  %vm692_vm7 = vcmp.ne.s32.totalorder %v93_v12, 0  ;;  %v105_v19 = vstv %s660_s28  ;;  %v132_v24 = vstv %s668_s29  ;;  %s613_s15 = smov [#allocation10]   ;;  %s614_s17 = smov [#allocation9]  }
  0x24   :  { %vm75_vm9 = vmor %vm688_vm5, %vm676_vm4  ;;  %vm79_vm10 = vcmp.gt.f32.partialorder %v654_v1, %v77_v14  ;;  %v717_v23 = vsub.f32 %v683_v16, %v105_v19  ;;  %v726_v27 = vsub.f32 %v683_v16, %v132_v24  ;;  %v162_v28 = vstv %s670_s30  ;;  %s455_s16 = sshll.u32 %s613_s15, 4  ;;  %s445_s18 = sshll.u32 %s614_s17, 4  ;;  %s456_s16 = int_to_ptr.vmem [resolvable:$true] %s455_s16  ;;  %s914_s18 = int_to_ptr.vmem [resolvable:$true] %s445_s18 }
  0x25   :  { %v80_v21 = vsel %vm79_vm10, %v654_v1, %v77_v14  ;;  %v709_v22 = vsel %vm79_vm10, 2, %v81_v15  ;;  %vm85_vm11 = vmor %vm75_vm9, %vm84_vm6  ;;  %vm612_vm13 = vmmov 1   ;;  %v732_v30 = vsub.f32 %v683_v16, %v162_v28  ;;  %v226_v38 = vld [vmem:[#allocation3] sm:$0x1]  ;;  %s556_s19 = scalar_lea.vmem %s456_s16, 16  ;;  %s560_s20 = scalar_lea.vmem %s456_s16, 32 }
  0x26   :  { %v720_v25 = vrot.slane %v80_v21, 7  ;;  %v91_v26 = vrot.slane %v709_v22, 7  ;;  %vm95_vm12 = vmor %vm85_vm11, %vm692_vm7  ;;  %v116_v29 = vand.u32 2147483647, %v717_v23  ;;  %v192_v31 = vstv %s673_s6  ;;  %p557_p10 = scmp.ne.s32.totalorder %s456_s16, %s556_s19  ;;  %p561_p11 = scmp.lt.s32.totalorder %s456_s16, %s456_s16 }
  0x27   :  { %vm102_vm14 = vmxor %vm95_vm12, %vm612_vm13  ;;  %v143_v33 = vand.u32 2147483647, %v726_v27  ;;  %v745_v34 = vsub.f32 %v683_v16, %v192_v31  ;;  %vm231_vm1 = vcmp.ne.f32.partialorder %v706_v20, %v706_v20  ;;  %vm224_vm2 = vcmask 57344   ;;  %p562_p12 = scmp.lt.s32.totalorder %s560_s20, %s556_s19 }
  0x28   :  { %vm89_vm15 = vcmp.gt.f32.partialorder %v654_v1, %v720_v25  ;;  %vm739_vm0 = vmand %vm58_vm8, %vm102_vm14  ;;  %v117_v37 = vsub.f32 0.0, %v116_v29  ;;  %v173_v42 = vand.u32 2147483647, %v732_v30  ;;  %v232_v46 = vsel %vm231_vm1, 1, %v611_v5 }
  0x29   :  { %v90_v35 = vsel %vm89_vm15, %v654_v1, %v720_v25  ;;  %v92_v36 = vsel %vm89_vm15, 3, %v91_v26  ;;  %v144_v41 = vsub.f32 0.0, %v143_v33  ;;  %v203_v44 = vand.u32 2147483647, %v745_v34  ;;  %p563_p13 = por %p562_p12, %p561_p11 }
  0x2a   :  { %v97_v39 = vrot.slane %v90_v35, 7  ;;  %v100_v40 = vrot.slane %v92_v36, 7  ;;  %v118_v43 = vmul.f32 1.442695, %v117_v37  ;;  %v476_v45 = vsel %vm739_vm0, 1.0, %v610_v2 }
  0x2b   :  { %v145_v47 = vmul.f32 1.442695, %v144_v41  ;;  %v174_v48 = vsub.f32 0.0, %v173_v42  ;;  %v229_v49 = vadd.f32 %v476_v45, %v226_v38  ;;  %v204_v51 = vsub.f32 0.0, %v203_v44  ;;  %p564_p0 = pnand %p563_p13, %p557_p10 }
  0x2c   :  { %vm99_vm3 = vcmp.gt.f32.partialorder %v654_v1, %v97_v39  ;;  %494 = vpow2.f32 %v118_v43  ;;  %v233_v52 = vrot.slane %v232_v46, 3  ;;  %v239_v56 = vrot.slane %v232_v46, 4 }
  0x2d   :  { %v101_v50 = vsel %vm99_vm3, 4, %v100_v40  ;;  %496 = vpow2.f32 %v145_v47  ;;  %230 = vst.msk [vmem:[#allocation3] sm:$0x1] %vm224_vm2, %v229_v49  ;;  %v175_v53 = vmul.f32 1.442695, %v174_v48  ;;  %v251_v0 = vstv %s760_s1 }
  0x2e   :  { %vm107_vm6 = vcmp.gt.s32.totalorder %v101_v50, 0  ;;  %vm134_vm7 = vcmp.gt.s32.totalorder %v101_v50, 1  ;;  %vm164_vm10 = vcmp.gt.s32.totalorder %v101_v50, 2  ;;  %v205_v55 = vmul.f32 1.442695, %v204_v51 }
  0x2f   :  { %v469_v54 = vsel %vm107_vm6, 1.0, %v610_v2  ;;  %498 = vpow2.f32 %v175_v53  ;;  %v471_v57 = vsel %vm134_vm7, 1.0, %v610_v2  ;;  %v473_v58 = vsel %vm164_vm10, 1.0, %v610_v2  ;;  %v221_v51 = vld [vmem:[#allocation2] sm:$0x1] }
  0x30   :  { %vm234_vm11 = vcmp.ne.s32.totalorder %v233_v52, 0  ;;  %500 = vpow2.f32 %v205_v55  ;;  %v112_v59 = vrot.slane %v469_v54, 4  ;;  %vm194_vm12 = vcmp.gt.s32.totalorder %v101_v50, 3 }
  0x31   :  { %v139_v60 = vrot.slane %v471_v57, 3  ;;  %v169_v61 = vrot.slane %v473_v58, 2  ;;  %vm774_vm14 = vmor %vm75_vm9, %vm234_vm11  ;;  %vm778_vm15 = vcmp.ne.s32.totalorder %v239_v56, 0  ;;  %v110_v3 = vmax.f32 %v717_v23, 0.0 }
  0x32   :  { %v137_v5 = vmax.f32 %v726_v27, 0.0  ;;  %v475_v6 = vsel %vm194_vm12, 1.0, %v610_v2  ;;  %v114_v8 = vmul.f32 %v112_v59, %v717_v23  ;;  %v167_v10 = vmax.f32 %v732_v30, 0.0  ;;  %vm241_vm5 = vmor %vm774_vm14, %vm778_vm15 }
  0x33   :  { %vm236_vm4 = vcmp.gt.f32.partialorder %v706_v20, %v720_v25  ;;  %v141_v11 = vmul.f32 %v139_v60, %v726_v27  ;;  %v171_v13 = vmul.f32 %v169_v61, %v732_v30  ;;  %v797_v14 = vsub.f32 %v683_v16, %v251_v0  ;;  %vm248_vm9 = vmxor %vm241_vm5, %vm612_vm13 }
  0x34   :  { %v197_v15 = vmax.f32 %v745_v34, 0.0  ;;  %v199_v17 = vrot.slane %v475_v6, 1  ;;  %v278_v18 = vstv %s765_s10  ;;  %v237_v23 = vsel %vm236_vm4, %v706_v20, %v720_v25  ;;  %vm827_vm13 = vmand %vm58_vm8, %vm248_vm9 }
  0x35   :  { %v809_v24 = vsel %vm236_vm4, 3, %v91_v26  ;;  %v115_v27 = vsub.f32 %v110_v3, %v114_v8  ;;  %v308_v30 = vstv %s767_s11  ;;  %v142_v33 = vsub.f32 %v137_v5, %v141_v11 }
  0x36   :  { %v495_v1 = vpop.eup %494  ;;  %v819_v35 = vsub.f32 %v167_v10, %v171_v13  ;;  %v262_v22 = vand.u32 2147483647, %v797_v14  ;;  %v823_v25 = vsub.f32 %v683_v16, %v278_v18  ;;  %v833_v42 = vsub.f32 %v683_v16, %v308_v30  ;;  %v392_v13 = vld [vmem:[#allocation3] sm:$0x1] }
  0x37   :  { %v497_v7 = vpop.eup %496  ;;  %v120_v9 = vadd.f32 1.0, %v495_v1  ;;  %v123_v21 = vmul.f32 -0.5, %v495_v1  ;;  %v126_v26 = vand.u32 2147483647, %v495_v1  ;;  %v201_v44 = vmul.f32 %v199_v17, %v745_v34 }
  0x38   :  { %v147_v12 = vadd.f32 1.0, %v497_v7  ;;  %v150_v28 = vmul.f32 -0.5, %v497_v7  ;;  %v153_v36 = vand.u32 2147483647, %v497_v7  ;;  %v263_v41 = vsub.f32 0.0, %v262_v22 }
  0x39   :  { %502 = vlog2.f32 %v120_v9  ;;  %v803_v19 = vpop.eup %498  ;;  %v124_v39 = vadd.f32 1.0, %v123_v21  ;;  %v243_v46 = vrot.slane %v237_v23, 7  ;;  %v246_v47 = vrot.slane %v809_v24, 7 }
  0x3a   :  { %504 = vlog2.f32 %v147_v12  ;;  %v177_v29 = vadd.f32 1.0, %v803_v19  ;;  %v501_v31 = vpop.eup %500  ;;  %v180_v40 = vmul.f32 -0.5, %v803_v19  ;;  %v151_v43 = vadd.f32 1.0, %v150_v28  ;;  %v377_v12 = vld [vmem:[#allocation3 + $0x1] sm:$0x1] }
  0x3b   :  { %v207_v37 = vadd.f32 1.0, %v501_v31  ;;  %v210_v45 = vmul.f32 -0.5, %v501_v31  ;;  %v264_v48 = vmul.f32 1.442695, %v263_v41  ;;  %v485_v49 = vsel %vm827_vm13, 1.0, %v610_v2 }
  0x3c   :  { %506 = vlog2.f32 %v177_v29  ;;  %vm840_vm8 = vcmp.lt.f32.partialorder %v126_v26, 0.0004427343  ;;  %vm844_vm1 = vcmp.lt.f32.partialorder %v153_v36, 0.0004427343  ;;  %v289_v34 = vand.u32 2147483647, %v823_v25 }
  0x3d   :  { %508 = vlog2.f32 %v207_v37  ;;  %v338_v52 = vstv %s801_s12  ;;  %v125_v53 = vmul.f32 %v495_v1, %v124_v39  ;;  %v181_v54 = vadd.f32 1.0, %v180_v40 }
  0x3e   :  { %510 = vpow2.f32 %v264_v48  ;;  %v319_v55 = vand.u32 2147483647, %v833_v42  ;;  %v152_v57 = vmul.f32 %v497_v7, %v151_v43  ;;  %v183_v58 = vand.u32 2147483647, %v803_v19 }
  0x3f   :  { %v211_v59 = vadd.f32 1.0, %v210_v45  ;;  %v290_v60 = vsub.f32 0.0, %v289_v34  ;;  %v202_v63 = vsub.f32 %v197_v15, %v201_v44  ;;  %v213_v0 = vand.u32 2147483647, %v501_v31 }
  0x40   :  { %v320_v3 = vsub.f32 0.0, %v319_v55  ;;  %v853_v8 = vsub.f32 %v683_v16, %v338_v52  ;;  %v381_v1 = vrot.slane %v485_v49, 5  ;;  %v182_v7 = vmul.f32 %v803_v19, %v181_v54 }
  0x41   :  { %v291_v6 = vmul.f32 1.442695, %v290_v60  ;;  %vm859_vm3 = vcmp.gt.f32.partialorder %v706_v20, %v243_v46  ;;  %vm865_vm6 = vcmp.lt.f32.partialorder %v183_v58, 0.0004427343  ;;  %v212_v18 = vmul.f32 %v501_v31, %v211_v59 }
  0x42   :  { %v321_v11 = vmul.f32 1.442695, %v320_v3  ;;  %vm869_vm7 = vcmp.lt.f32.partialorder %v213_v0, 0.0004427343  ;;  %v349_v28 = vand.u32 2147483647, %v853_v8  ;;  %v383_v29 = vadd.f32 %v381_v1, %v377_v12 }
  0x43   :  { %v503_v56 = vpop.eup %502  ;;  %512 = vpow2.f32 %v291_v6  ;;  %v393_v30 = vsel %vm224_vm2, %v392_v13, 0.0  ;;  %v247_v40 = vsel %vm859_vm3, 4, %v246_v47  ;;  %v256_v32 = vmax.f32 %v797_v14, 0.0 }
  0x44   :  { %v505_v61 = vpop.eup %504  ;;  %v122_v62 = vmul.f32 0.6931472, %v503_v56  ;;  %514 = vpow2.f32 %v321_v11  ;;  %394 = vadd.xlane.f32.xlu0 %v393_v30  ;;  %384 = vst.msk [vmem:[#allocation3 + $0x1] sm:$0x1] %vm224_vm2, %v383_v29  ;;  %vm253_vm10 = vcmp.gt.s32.totalorder %v247_v40, 0  ;;  %vm280_vm11 = vcmp.gt.s32.totalorder %v247_v40, 1 }
  0x45   :  { %v149_v5 = vmul.f32 0.6931472, %v505_v61  ;;  %vm310_vm12 = vcmp.gt.s32.totalorder %v247_v40, 2  ;;  %v480_v52 = vsel %vm280_vm11, 1.0, %v610_v2  ;;  %v283_v6 = vmax.f32 %v823_v25, 0.0 }
  0x46   :  { %v128_v9 = vsel %vm840_vm8, %v125_v53, %v122_v62  ;;  %v507_v15 = vpop.eup %506  ;;  %v482_v58 = vsel %vm310_vm12, 1.0, %v610_v2  ;;  %v285_v60 = vrot.slane %v480_v52, 4  ;;  %v425_v38 = vstv %s486_s14 }
  0x47   :  { %v155_v17 = vsel %vm844_vm1, %v152_v57, %v149_v5  ;;  %v129_v21 = vadd.f32 %v128_v9, %v115_v27  ;;  %v179_v23 = vmul.f32 0.6931472, %v507_v15  ;;  %v509_v20 = vpop.eup %508  ;;  %v315_v0 = vrot.slane %v482_v58, 3 }
  0x48   :  { %v156_v19 = vadd.f32 %v155_v17, %v142_v33  ;;  %v209_v31 = vmul.f32 0.6931472, %v509_v20  ;;  %v350_v33 = vsub.f32 0.0, %v349_v28  ;;  %v511_v36 = vpop.eup %510  ;;  %v313_v15 = vmax.f32 %v833_v42, 0.0 }
  0x49   :  { %v185_v26 = vsel %vm865_vm6, %v182_v7, %v179_v23  ;;  %v266_v44 = vadd.f32 1.0, %v511_v36  ;;  %v269_v57 = vmul.f32 -0.5, %v511_v36  ;;  %v272_v9 = vand.u32 2147483647, %v511_v36 }
  0x4a   :  { %v158_v22 = vrot.slane %v156_v19, 1  ;;  %v186_v27 = vadd.f32 %v185_v26, %v819_v35  ;;  %v215_v39 = vsel %vm869_vm7, %v212_v18, %v209_v31  ;;  %v351_v45 = vmul.f32 1.442695, %v350_v33 }
  0x4b   :  { %v216_v43 = vadd.f32 %v215_v39, %v202_v63  ;;  %516 = vlog2.f32 %v266_v44  ;;  %v478_v35 = vsel %vm253_vm10, 1.0, %v610_v2  ;;  %v414_v53 = vld [vmem:[#allocation3 + $0x1] sm:$0x1]  ;;  %v270_v5 = vadd.f32 1.0, %v269_v57 }
  0x4c   :  { %v160_v37 = vadd.f32 %v158_v22, %v129_v21  ;;  %v188_v41 = vrot.slane %v186_v27, 2  ;;  %518 = vpow2.f32 %v351_v45  ;;  %v258_v55 = vrot.slane %v478_v35, 5 }
  0x4d   :  { %v218_v48 = vrot.slane %v216_v43, 3  ;;  %v513_v49 = vpop.eup %512  ;;  %v415_v62 = vsel %vm224_vm2, %v414_v53, 0.0  ;;  %v287_v7 = vmul.f32 %v285_v60, %v823_v25  ;;  %v317_v17 = vmul.f32 %v315_v0, %v833_v42  ;;  %v367_v60 = vld [vmem:[#allocation2 + $0x1] sm:$0x1] }
  0x4e   :  { %v190_v46 = vadd.f32 %v188_v41, %v160_v37  ;;  %v515_v34 = vpop.eup %514  ;;  %v293_v47 = vadd.f32 1.0, %v513_v49  ;;  %v296_v61 = vmul.f32 -0.5, %v513_v49  ;;  %416 = vadd.xlane.f32.xlu0 %v415_v62  ;;  %v260_v3 = vmul.f32 %v258_v55, %v797_v14 }
  0x4f   :  { %v323_v56 = vadd.f32 1.0, %v515_v34  ;;  %v326_v63 = vmul.f32 -0.5, %v515_v34  ;;  %v299_v12 = vand.u32 2147483647, %v513_v49  ;;  %v329_v16 = vand.u32 2147483647, %v515_v34 }
  0x50   :  { %v220_v50 = vadd.f32 %v218_v48, %v190_v46  ;;  %520 = vlog2.f32 %v293_v47  ;;  %v297_v10 = vadd.f32 1.0, %v296_v61  ;;  %v261_v21 = vsub.f32 %v256_v32, %v260_v3 }
  0x51   :  { %522 = vlog2.f32 %v323_v56  ;;  %v327_v13 = vadd.f32 1.0, %v326_v63  ;;  %v271_v19 = vmul.f32 %v511_v36, %v270_v5  ;;  %vm897_vm14 = vcmp.lt.f32.partialorder %v272_v9, 0.0004427343 }
  0x52   :  { %v222_v54 = vsel %vm739_vm0, %v220_v50, 0.0  ;;  %vm340_vm0 = vcmp.gt.s32.totalorder %v247_v40, 3  ;;  %v288_v25 = vsub.f32 %v283_v6, %v287_v7  ;;  %v298_v24 = vmul.f32 %v513_v49, %v297_v10 }
  0x53   :  { %v223_v59 = vadd.f32 %v222_v54, %v221_v51  ;;  %v484_v23 = vsel %vm340_vm0, 1.0, %v610_v2  ;;  %vm300_vm15 = vcmp.lt.f32.partialorder %v299_v12, 0.0004427343  ;;  %v328_v30 = vmul.f32 %v515_v34, %v327_v13 }
  0x54   :  { %v318_v27 = vsub.f32 %v313_v15, %v317_v17  ;;  %vm330_vm4 = vcmp.lt.f32.partialorder %v329_v16, 0.0004427343  ;;  %v345_v33 = vrot.slane %v484_v23, 2  ;;  %v343_v41 = vmax.f32 %v853_v8, 0.0 }
  0x55   :  { %225 = vst.msk [vmem:[#allocation2] sm:$0x1] %vm224_vm2, %v223_v59  ;;  %v517_v1 = vpop.eup %516  ;;  %vm428_vm8 = vcmp.eq.s32.totalorder %v663_v4, 1  ;;  %vm432_vm1 = vcmask 8192   ;;  %vm437_vm3 = vcmask 0  }
  0x56   :  { %v519_v11 = vpop.eup %518  ;;  %v268_v14 = vmul.f32 0.6931472, %v517_v1  ;;  %v347_v46 = vmul.f32 %v345_v33, %v853_v8  ;;  %v403_v1 = vstv %s402_s13 }
  0x57   :  { %v353_v18 = vadd.f32 1.0, %v519_v11  ;;  %v356_v22 = vmul.f32 -0.5, %v519_v11  ;;  %v359_v48 = vand.u32 2147483647, %v519_v11 }
  0x58   :  { %v274_v2 = vsel %vm897_vm14, %v271_v19, %v268_v14  ;;  %v348_v52 = vsub.f32 %v343_v41, %v347_v46 }
  0x59   :  { %524 = vlog2.f32 %v353_v18  ;;  %v357_v43 = vadd.f32 1.0, %v356_v22  ;;  %v275_v44 = vadd.f32 %v274_v2, %v261_v21  ;;  %vm360_vm5 = vcmp.lt.f32.partialorder %v359_v48, 0.0004427343 }
  0x5a   :  { %v521_v29 = vpop.eup %520 }
  0x5b   :  { %v523_v26 = vpop.eup %522  ;;  %v295_v31 = vmul.f32 0.6931472, %v521_v29  ;;  %v358_v49 = vmul.f32 %v519_v11, %v357_v43 }
  0x5c   :  { %v388_v28 = vld [vmem:[#allocation2] sm:$0x1]  ;;  %v325_v36 = vmul.f32 0.6931472, %v523_v26 }
  0x5d   :  { %v389_v42 = vsel %vm224_vm2, %v388_v28, 0.0  ;;  %v301_v37 = vsel %vm300_vm15, %v298_v24, %v295_v31 }
  0x5e   :  { %390 = vadd.xlane.f32.xlu1 %v389_v42  ;;  %v302_v39 = vadd.f32 %v301_v37, %v288_v25  ;;  %v331_v40 = vsel %vm330_vm4, %v328_v30, %v325_v36 }
  0x5f   :  { %v332_v45 = vadd.f32 %v331_v40, %v318_v27 }
  0x60   :  { %v304_v35 = vrot.slane %v302_v39, 1 }
  0x61   :  { %v334_v34 = vrot.slane %v332_v45, 2 }
  0x62   :  { %v306_v51 = vadd.f32 %v304_v35, %v275_v44 }
  0x63   :  { %v525_v50 = vpop.eup %524 }
  0x64   :  { %v355_v47 = vmul.f32 0.6931472, %v525_v50  ;;  %v336_v54 = vadd.f32 %v334_v34, %v306_v51 }
  0x66   :  { %v361_v53 = vsel %vm360_vm5, %v358_v49, %v355_v47 }
  0x67   :  { %v362_v55 = vadd.f32 %v361_v53, %v348_v52 }
  0x69   :  { %v364_v56 = vrot.slane %v362_v55, 3 }
  0x6b   :  { %v366_v57 = vadd.f32 %v364_v56, %v336_v54 }
  0x6d   :  { %v369_v58 = vrot.slane %v366_v57, 7 }
  0x6f   :  { %v371_v59 = vsel %vm827_vm13, %v369_v58, 0.0 }
  0x70   :  { %v373_v8 = vrot.slane %v371_v59, 5 }
  0x72   :  { %v375_v61 = vadd.f32 %v373_v8, %v367_v60 }
  0x74   :  { %376 = vst.msk [vmem:[#allocation2 + $0x1] sm:$0x1] %vm224_vm2, %v375_v61 }
  0x7b   :  { %v410_v62 = vld [vmem:[#allocation2 + $0x1] sm:$0x1] }
  0x7c   :  { %v411_v63 = vsel %vm224_vm2, %v410_v62, 0.0  ;;  %vm406_vm2 = vcmp.eq.s32.totalorder %v663_v4, 0 }
  0x7d   :  { %412 = vadd.xlane.f32.xlu1 %v411_v63 }
  0xd1   :  { %v395_v0 = vpop.xlane.xlu0 %394 }
  0xd2   :  { %v396_v32 = vmul.f32 4.0, %v395_v0  ;;  %vm398_vm9 = vcmp.gt.f32.partialorder %v395_v0, 0.0 }
  0xd3   :  { %v404_v7 = vsel %vm398_vm9, %v403_v1, 0.0 }
  0xd4   :  { %v397_v3 = vmax.f32 %v396_v32, 1.0 }
  0xd6   :  { %526 = vrcp.f32 %v397_v3 }
  0xdb   :  { %v417_v5 = vpop.xlane.xlu0 %416 }
  0xdc   :  { %v418_v6 = vmul.f32 4.0, %v417_v5  ;;  %vm420_vm13 = vcmp.gt.f32.partialorder %v417_v5, 0.0 }
  0xdd   :  { %v426_v10 = vsel %vm420_vm13, %v425_v38, 0.0 }
  0xde   :  { %v419_v9 = vmax.f32 %v418_v6, 1.0  ;;  %v431_v11 = vadd.f32 %v426_v10, %v404_v7 }
  0xe0   :  { %528 = vrcp.f32 %v419_v9  ;;  %v527_v12 = vpop.eup %526  ;;  %v434_v15 = vmax.f32 %v431_v11, 1e-08 }
  0xe2   :  { %530 = vrcp.f32 %v434_v15 }
  0xea   :  { %v529_v16 = vpop.eup %528 }
  0xeb   :  { %v391_v13 = vpop.xlane.xlu1 %390 }
  0xec   :  { %v400_v17 = vmul.f32 %v527_v12, %v391_v13  ;;  %v531_v29 = vpop.eup %530 }
  0xee   :  { %v401_v18 = vsel %vm398_vm9, %v400_v17, 0.0 }
  0xef   :  { %v405_v14 = vmul.f32 %v404_v7, %v401_v18 }
  0xf1   :  { %v407_v25 = vsel %vm406_vm2, %v405_v14, 0.0 }
 0x10a   :  { %v413_v21 = vpop.xlane.xlu1 %412 }
 0x10b   :  { %v422_v19 = vmul.f32 %v529_v16, %v413_v21 }
 0x10d   :  { %v423_v23 = vsel %vm420_vm13, %v422_v19, 0.0 }
 0x10e   :  { %v427_v20 = vmul.f32 %v426_v10, %v423_v23 }
 0x110   :  { %v430_v24 = vadd.f32 %v427_v20, %v405_v14  ;;  %v429_v28 = vsel %vm428_vm8, %v427_v20, %v407_v25 }
 0x111   :  { %433 = vst.msk [vmem:[#allocation10] sm:$0x1] %vm432_vm1, %v429_v28 }
 0x112   :  { %v436_v30 = vmul.f32 %v531_v29, %v430_v24 }
 0x113   :  { %567 = shalt.err (!%p564_p0)
}
 0x114   :  { %s568_s23 = scalar_lea.hbm %s952_s5, 16 }
 0x115   :  { %p569_p1 = scmp.ne.s32.totalorder %s952_s5, %s568_s23  ;;  %p572_p2 = scmp.lt.u32.totalorder %s568_s23, %s952_s5 }
 0x117   :  { %p574_p3 = pnand %p572_p2, %p569_p1 }
 0x119   :  { %577 = shalt.err (!%p574_p3)
}
 0x11a   :  { %458 = dma.vmem_to_hbm [thread:$0]  %s456_s16, 16, %s952_s5, [#allocation11]   ;;  %438 = vst.msk [vmem:[#allocation9] sm:$0x1] %vm437_vm3, %v436_v30 }
 0x11b   :  { %s578_s28 = scalar_lea.vmem %s914_s18, 16  ;;  %s582_s29 = scalar_lea.vmem %s914_s18, 32 }
 0x11c   :  { %p579_p4 = scmp.ne.s32.totalorder %s914_s18, %s578_s28  ;;  %p583_p5 = scmp.lt.s32.totalorder %s914_s18, %s914_s18 }
 0x11d   :  { %p584_p6 = scmp.lt.s32.totalorder %s582_s29, %s578_s28 }
 0x11f   :  { %p585_p7 = por %p584_p6, %p583_p5 }
 0x121   :  { %p586_p8 = pnand %p585_p7, %p579_p4 }
 0x123   :  { %589 = shalt.err (!%p586_p8)
}
 0x124   :  { %s590_s7 = scalar_lea.hbm %s951_s4, 16 }
 0x125   :  { %p591_p9 = scmp.ne.s32.totalorder %s951_s4, %s590_s7  ;;  %p594_p10 = scmp.lt.u32.totalorder %s590_s7, %s951_s4 }
 0x127   :  { %p596_p11 = pnand %p594_p10, %p591_p9 }
 0x129   :  { %599 = shalt.err (!%p596_p11)
}
 0x12a   :  { %448 = dma.vmem_to_hbm [thread:$0]  %s914_s18, 16, %s951_s4, [#allocation5]  }
 0x12b   :  { %604 = dma.done.wait [#allocation5], 16  }
 0x12c   :  { %605 = vsyncadd [#allocation5], 4294967280 }
 0x12d   :  { %606 = dma.done.wait [#allocation11], 16  }
 0x12e   :  { %607 = vsyncadd [#allocation11], 4294967280 }
 0x12f   :  { %465 = vsyncpa [#allocation5], 1 }
 0x130   :  { %466 = vsyncpa [#allocation11], 1 }
 0x131   :  { %467 = vsyncpa [#allocation6], 1 }
 0x132   :  { %468 = vsyncpa [#allocation8], 1 }

</bundles_post_ra>
